<compile_context>
chip_gen: v5e
topology: v5e:2x2
jax: 0.10.0
libtpu: 0.0.40
codegen_flags: <defaults>
</compile_context>

<pallas_src>
import functools

import jax
import jax.numpy as jnp
from jax import lax
from jax.experimental import pallas as pl
from jax.experimental.pallas import tpu as pltpu

KSIZE = 7
PAD = KSIZE // 2


def _pick_c_block(C, HW, itemsize, budget_bytes=2 * 1024 * 1024):
    """Channel block size: full C if the (C, HW) block fits ~2 MiB, otherwise
    a multiple of 8 (required by the (8, 128) BlockSpec rule when c_blk < C)."""
    if C * HW * itemsize <= budget_bytes or C <= 8:
        return C
    blk = (budget_bytes // (HW * itemsize)) // 8 * 8
    blk = int(max(8, min(blk, (C // 8) * 8)))
    return blk


def _reduce_kernel(x_ref, planes_ref, sum_ref, max_ref, *,
                   C, c_blk, HW, sub, chunk, kc, ragged):
    # x_ref      : VMEM 16/32-bit [1, c_blk, HW]  one channel block of one sample
    # planes_ref : VMEM f32      [1, 2, HW]       avg (row 0) / max (row 1)
    # sum_ref    : VMEM f32      [sub, HW]        cross-step partial sums   (kc > 1)
    # max_ref    : VMEM f32      [sub, HW]        cross-step partial maxes  (kc > 1)
    k = pl.program_id(1)
    n_chunks = (HW + chunk - 1) // chunk
    n_full = c_blk // sub
    rem = c_blk - n_full * sub       # > 0 only when c_blk == C and C % 8 != 0
    pairs = n_full // 2
    odd = n_full - 2 * pairs
    inv_c = jnp.float32(1.0 / C)

    if kc > 1:
        @pl.when(k == 0)
        def _():
            sum_ref[...] = jnp.zeros_like(sum_ref)
            max_ref[...] = jnp.full_like(max_ref, -jnp.inf)

    if ragged:
        # Valid channels remaining in this block (only the last k is ragged).
        chans_left = C - k * c_blk

    for ci in range(n_chunks):
        p0 = ci * chunk
        cw = min(chunk, HW - p0)

        def load_slab(c0, rows):
            a = x_ref[0, pl.ds(c0, rows), pl.ds(p0, cw)].astype(jnp.float32)
            if ragged:
                row = lax.broadcasted_iota(jnp.int32, (rows, cw), 0)
                ok = row < (chans_left - c0)
                return jnp.where(ok, a, 0.0), jnp.where(ok, a, -jnp.inf)
            return a, a

        # Register-carried partial accumulators for this lane chunk.
        if kc > 1:
            s0 = sum_ref[:, pl.ds(p0, cw)]
            m0 = max_ref[:, pl.ds(p0, cw)]
        else:
            s0 = jnp.zeros((sub, cw), jnp.float32)
            m0 = jnp.full((sub, cw), -jnp.inf, jnp.float32)

        if pairs > 0:
            # Second independent accumulator pair -> shorter VALU dep chain.
            s1 = jnp.zeros((sub, cw), jnp.float32)
            m1 = jnp.full((sub, cw), -jnp.inf, jnp.float32)

            def body(i, carry):
                sa, ma, sb, mb = carry
                c0 = pl.multiple_of(i * (2 * sub), sub)
                a_s, a_m = load_slab(c0, sub)
                b_s, b_m = load_slab(c0 + sub, sub)
                return (sa + a_s, jnp.maximum(ma, a_m),
                        sb + b_s, jnp.maximum(mb, b_m))

            s0, m0, s1, m1 = lax.fori_loop(
                0, pairs, body, (s0, m0, s1, m1), unroll=2)
            s0 = s0 + s1
            m0 = jnp.maximum(m0, m1)

        if odd:
            a_s, a_m = load_slab((n_full - 1) * sub, sub)
            s0 = s0 + a_s
            m0 = jnp.maximum(m0, a_m)

        if rem:
            # Tail channels (< sub rows); pad to sub rows with neutral values.
            a = x_ref[0, pl.ds(n_full * sub, rem),
                      pl.ds(p0, cw)].astype(jnp.float32)
            s0 = s0 + jnp.concatenate(
                [a, jnp.zeros((sub - rem, cw), jnp.float32)], axis=0)
            m0 = jnp.maximum(m0, jnp.concatenate(
                [a, jnp.full((sub - rem, cw), -jnp.inf, jnp.float32)], axis=0))

        def finalize():
            planes_ref[0, 0:1, pl.ds(p0, cw)] = (
                jnp.sum(s0, axis=0, keepdims=True) * inv_c)
            planes_ref[0, 1:2, pl.ds(p0, cw)] = (
                jnp.max(m0, axis=0, keepdims=True))

        if kc == 1:
            finalize()
        else:
            @pl.when(k < kc - 1)
            def _():
                sum_ref[:, pl.ds(p0, cw)] = s0
                max_ref[:, pl.ds(p0, cw)] = m0

            @pl.when(k == kc - 1)
            def _():
                finalize()


def _conv_kernel(w_ref, p_ref, o_ref, *, H, W):
    # w_ref : SMEM f32[98]          flattened conv weights (ch, ky, kx)
    # p_ref : VMEM f32[1, 2, H, W]  avg / max planes for one sample
    # o_ref : VMEM     [1, 1, H, W] attention map in the requested dtype
    Hp = H + 2 * PAD
    acc = jnp.zeros((H, W), jnp.float32)
    zr = jnp.zeros((PAD, W), jnp.float32)
    zc = jnp.zeros((Hp, PAD), jnp.float32)
    for ch in range(2):
        plane = p_ref[0, ch]                                   # (H, W)
        padded = jnp.concatenate([zr, plane, zr], axis=0)      # (Hp, W)
        padded = jnp.concatenate([zc, padded, zc], axis=1)     # (Hp, Wp)
        for kx in range(KSIZE):
            shifted = padded[:, kx:kx + W]                     # 1 lane shift / kx
            for ky in range(KSIZE):
                wgt = w_ref[ch * KSIZE * KSIZE + ky * KSIZE + kx]
                acc = acc + wgt * shifted[ky:ky + H, :]        # sublane offsets
    o_ref[...] = jax.nn.sigmoid(acc).astype(o_ref.dtype)[None, None]


def spatial_attention(x, w):
    """SpatialAttention forward.

    x: (N, C, H, W) bf16 / fp16 / f32 feature map (fp16 handled as bf16 storage).
    w: (1, 2, 7, 7) conv weights, no bias.
    Returns: (N, 1, H, W) attention map in x's dtype.
    """
    orig_dtype = x.dtype
    if x.dtype == jnp.float16:
        # TODO(synk): no native fp16 compute on TPU; use bf16 storage/compute.
        x = x.astype(jnp.bfloat16)

    N, C, H, W = x.shape
    assert w.shape == (1, 2, KSIZE, KSIZE), w.shape
    HW = H * W
    w32 = w.astype(jnp.float32).reshape(-1)

    # Lane-dense view for the heavy channel-reduction pass (free reshape: only
    # the two contiguous minor dims are merged).
    x_flat = x.reshape(N, C, HW)

    c_blk = _pick_c_block(C, HW, x.dtype.itemsize)
    kc = -(-C // c_blk)
    ragged = (C % c_blk) != 0
    sub = 8 if c_blk >= 8 else c_blk
    chunk = min(HW, 512)
    acc_cols = HW if kc > 1 else 128      # scratch unused when kc == 1

    reduce_kernel = functools.partial(
        _reduce_kernel, C=C, c_blk=c_blk, HW=HW, sub=sub, chunk=chunk,
        kc=kc, ragged=ragged)

    x_spec_kwargs = {}
    if kc > 1 and c_blk * HW * x.dtype.itemsize <= 512 * 1024:
        # Small blocks -> short compute per step; deepen the input pipeline.
        x_spec_kwargs["pipeline_mode"] = pl.Buffered(3)

    planes = pl.pallas_call(
        reduce_kernel,
        out_shape=jax.ShapeDtypeStruct((N, 2, HW), jnp.float32),
        grid_spec=pltpu.PrefetchScalarGridSpec(
            num_scalar_prefetch=0,
            grid=(N, kc),
            in_specs=[
                pl.BlockSpec((1, c_blk, HW), lambda n, k: (n, k, 0),
                             **x_spec_kwargs),
            ],
            out_specs=pl.BlockSpec((1, 2, HW), lambda n, k: (n, 0, 0)),
            scratch_shapes=[
                pltpu.VMEM((sub, acc_cols), jnp.float32),   # partial sums
                pltpu.VMEM((sub, acc_cols), jnp.float32),   # partial maxes
            ],
        ),
        compiler_params=pltpu.CompilerParams(
            dimension_semantics=("parallel", "arbitrary")),
    )(x_flat)

    # Tiny per-sample 7x7 conv + sigmoid on the (2, H, W) planes.
    planes4 = planes.reshape(N, 2, H, W)   # free: splits the minor dim

    conv_kernel = functools.partial(_conv_kernel, H=H, W=W)

    out = pl.pallas_call(
        conv_kernel,
        out_shape=jax.ShapeDtypeStruct((N, 1, H, W), x.dtype),
        grid_spec=pltpu.PrefetchScalarGridSpec(
            num_scalar_prefetch=0,
            grid=(N,),
            in_specs=[
                pl.BlockSpec(memory_space=pltpu.MemorySpace.SMEM),       # weights
                pl.BlockSpec((1, 2, H, W), lambda n: (n, 0, 0, 0)),      # planes
            ],
            out_specs=pl.BlockSpec((1, 1, H, W), lambda n: (n, 0, 0, 0)),
        ),
        compiler_params=pltpu.CompilerParams(
            dimension_semantics=("parallel",)),
    )(w32, planes4)

    return out.astype(orig_dtype)


if __name__ == "__main__":
    key = jax.random.PRNGKey(0)
    k_x, k_w = jax.random.split(key)

    N, C, H, W = 2, 4, 16, 16
    # bf16 end-to-end (TPU-native 16-bit analogue of the PyTorch .half() module).
    x = jax.random.normal(k_x, (N, C, H, W), jnp.float32).astype(jnp.bfloat16)

    # Deterministic Conv2d(2, 1, 7, bias=False) init (kaiming-uniform style).
    fan_in = 2 * KSIZE * KSIZE
    bound = 1.0 / (fan_in ** 0.5)
    w = jax.random.uniform(
        k_w, (1, 2, KSIZE, KSIZE), jnp.float32, -bound, bound
    ).astype(jnp.bfloat16)

    out = spatial_attention(x, w)
    jax.block_until_ready(out)

    assert out.shape == (N, 1, H, W), out.shape
    assert out.dtype == x.dtype, out.dtype
    assert bool(jnp.all(jnp.isfinite(out.astype(jnp.float32))))

    # Pure-JAX reference check.
    xf = x.astype(jnp.float32)
    planes = jnp.concatenate(
        [jnp.mean(xf, axis=1, keepdims=True),
         jnp.max(xf, axis=1, keepdims=True)], axis=1)
    ref = jax.nn.sigmoid(lax.conv_general_dilated(
        planes, w.astype(jnp.float32), (1, 1), ((PAD, PAD), (PAD, PAD)),
        dimension_numbers=("NCHW", "OIHW", "NCHW")))
    err = float(jnp.max(jnp.abs(out.astype(jnp.float32) - ref)))
    assert err < 2e-2, err

    print("KERNEL_OK")
</pallas_src>

<mosaic_0001>
module attributes {stable_mosaic.version = 11 : i64} {
  func.func @_reduce_kernel(%arg0: i32, %arg1: i32, %arg2: memref<1x4x256xbf16, #tpu.memory_space<vmem>>, %arg3: memref<1x2x256xf32, #tpu.memory_space<vmem>>, %arg4: memref<4x128xf32, #tpu.memory_space<vmem>>, %arg5: memref<4x128xf32, #tpu.memory_space<vmem>>) attributes {dimension_semantics = [#tpu.dimension_semantics<parallel>, #tpu.dimension_semantics<arbitrary>], iteration_bounds = array<i64: 2, 1>, scalar_prefetch = 0 : i64, scratch_operands = 2 : i64, tpu.core_type = #tpu.core_type<tc>, window_params = [{transform_indices = @transform_0, window_bounds = array<i64: 1, 4, 256>}, {transform_indices = @transform_1, window_bounds = array<i64: 1, 2, 256>}]} {
    %cst = arith.constant 0.000000e+00 : f32
    %0 = vector.broadcast %cst : f32 to vector<4x256xf32>
    %cst_0 = arith.constant 0xFF800000 : f32
    %1 = vector.broadcast %cst_0 : f32 to vector<4x256xf32>
    %c0 = arith.constant 0 : index
    %c0_1 = arith.constant 0 : index
    %c0_2 = arith.constant 0 : index
    %2 = vector.load %arg2[%c0, %c0_1, %c0_2] : memref<1x4x256xbf16, #tpu.memory_space<vmem>>, vector<1x4x256xbf16>
    %3 = vector.shape_cast %2 : vector<1x4x256xbf16> to vector<4x256xbf16>
    %4 = arith.extf %3 : vector<4x256xbf16> to vector<4x256xf32>
    %5 = arith.addf %0, %4 : vector<4x256xf32>
    %6 = arith.maximumf %1, %4 : vector<4x256xf32>
    %cst_3 = arith.constant dense<0.000000e+00> : vector<256xf32>
    %7 = vector.multi_reduction <add>, %5, %cst_3 [0] : vector<4x256xf32> to vector<256xf32>
    %8 = vector.shape_cast %7 : vector<256xf32> to vector<1x256xf32>
    %cst_4 = arith.constant 2.500000e-01 : f32
    %9 = vector.broadcast %cst_4 : f32 to vector<1x256xf32>
    %10 = arith.mulf %8, %9 : vector<1x256xf32>
    %c0_5 = arith.constant 0 : index
    %c0_6 = arith.constant 0 : index
    %c0_7 = arith.constant 0 : index
    %11 = vector.load %arg3[%c0_5, %c0_6, %c0_7] : memref<1x2x256xf32, #tpu.memory_space<vmem>>, vector<1x1x256xf32>
    %12 = vector.shape_cast %11 : vector<1x1x256xf32> to vector<1x256xf32>
    %13 = vector.shape_cast %10 : vector<1x256xf32> to vector<1x1x256xf32>
    tpu.vector_store %arg3[%c0_5, %c0_6, %c0_7], %13 {strides = array<i32>} : memref<1x2x256xf32, #tpu.memory_space<vmem>>, vector<1x1x256xf32>,
    %cst_8 = arith.constant dense<0xFF800000> : vector<256xf32>
    %14 = vector.multi_reduction <maximumf>, %6, %cst_8 [0] : vector<4x256xf32> to vector<256xf32>
    %15 = vector.shape_cast %14 : vector<256xf32> to vector<1x256xf32>
    %c0_9 = arith.constant 0 : index
    %c1 = arith.constant 1 : index
    %c0_10 = arith.constant 0 : index
    %16 = vector.load %arg3[%c0_9, %c1, %c0_10] : memref<1x2x256xf32, #tpu.memory_space<vmem>>, vector<1x1x256xf32>
    %17 = vector.shape_cast %16 : vector<1x1x256xf32> to vector<1x256xf32>
    %18 = vector.shape_cast %15 : vector<1x256xf32> to vector<1x1x256xf32>
    tpu.vector_store %arg3[%c0_9, %c1, %c0_10], %18 {strides = array<i32>} : memref<1x2x256xf32, #tpu.memory_space<vmem>>, vector<1x1x256xf32>,
    return
  }
  func.func @transform_0(%arg0: i32, %arg1: i32) -> (i32, i32, i32) {
    %c0_i32 = arith.constant 0 : i32
    %c0_i32_0 = arith.constant 0 : i32
    return %arg0, %arg1, %c0_i32 : i32, i32, i32
  }
  func.func @transform_1(%arg0: i32, %arg1: i32) -> (i32, i32, i32) {
    %c0_i32 = arith.constant 0 : i32
    %c0_i32_0 = arith.constant 0 : i32
    %c0_i32_1 = arith.constant 0 : i32
    return %arg0, %c0_i32, %c0_i32_0 : i32, i32, i32
  }
}

</mosaic_0001>

<bundles_post_ra>
// kernel: tpu_custom_call.1
= control target key start
LH: loop header
LB: loop body
LE: loop exit
PB: predicated region body
PF: predicated region fallthrough
CT: control target
= control target key end

     0   :  { %6 = vsyncpa [#allocation5], 0  ;;  %s652_s0 = inlined_call_operand.hbm [shape: bf16[2,4,256], index: 0, kind: input, shape index: {}]   ;;  %s653_s1 = inlined_call_operand.hbm [shape: f32[2,2,256], index: 1, kind: output, shape index: {}]  }
   0x1   :  { %8 = vsyncpa [#allocation5 + $0x1], 0 }
   0x2   :  { %9 = vsyncpa [#allocation6], 0 }
   0x3   :  { %11 = vsyncpa [#allocation6 + $0x1], 0  ;;  %s514_s6 = smov 0   ;;  %s516_s7 = smov 0  }
   0x4   :  { %s518_s8 = smov 0   ;;  %s520_s9 = smov 0  }
   0x5   :  { %s522_s10 = smov 0   ;;  %s524_s11 = smov 0  }
   0x6 LB: > { %s310_s12 = sadd.s32 4294967295, %s502_s11   ;;  %s311_s13 = sadd.s32 4294967294, %s502_s11   ;;  %s502_s11 = sphi %s524_s11, %s17_s11   ;;  %s498_s10 = sphi %s522_s10, %s664_s10   ;;  %s494_s9 = sphi %s520_s9, %s663_s9   ;;  %s490_s8 = sphi %s518_s8, %s662_s8   ;;  %s486_s7 = sphi %s516_s7, %s661_s7   ;;  %s482_s6 = sphi %s514_s6, %s660_s6  }
   0x7   : > { %s29_s14 = sadd.s32 1, %s498_s10  ;;  %s38_s15 = sadd.s32 1, %s490_s8 }
   0x8   : > { %p31_p0 = scmp.ge.s32.totalorder %s29_s14, 2  ;;  %p45_p1 = scmp.ne.s32.totalorder %s490_s8, %s486_s7 }
   0x9   : > { %p46_p2 = scmp.eq.s32.totalorder %s502_s11, 0  ;;  %p51_p3 = scmp.ne.s32.totalorder %s486_s7, %s482_s6 }
   0xa   : > { %s666_s14 = smov (%p31_p0, %s29_s14), 0  ;;  %p52_p5 = scmp.eq.s32.totalorder %s310_s12, 0 }
   0xb   : > { %p555_p4 = por %p46_p2, %p45_p1  ;;  %s33_s17 = ssub.s32 %s498_s10, %s666_s14 }
   0xc   : > { %p75_p6 = scmp.eq.s32.totalorder %s310_s12, 1  ;;  %p36_p7 = scmp.eq.s32.totalorder %s33_s17, 0 }
   0xd   : > { %p561_p8 = por %p52_p5, %p51_p3  ;;  %p81_p10 = scmp.eq.s32.totalorder %s311_s13, 1 }
   0xe   : > { %p565_p9 = por %p75_p6, %p45_p1  ;;  %p313_p12 = scmp.ge.s32.totalorder %s502_s11, 2 }
   0xf   : > { %s570_s20 = scalar_select %p36_p7, %s490_s8, %s38_s15  }
  0x10   : > { %p572_p11 = por %p81_p10, %p51_p3  ;;  %p340_p13 = scmp.lt.s32.totalorder %s502_s11, 2 }
  0x11   : > { %s101_s22 = sand.u32 1, %s490_s8   ;;  %s326_s24 = sshll.u32 %s498_s10, 2 }
  0x12   : > { %s314_s23 = sshll.u32 %s101_s22, 2  ;;  %s112_s27 = scalar_lea.hbm %s652_s0, %s326_s24 }
  0x13   : > { %s105_s28 = scalar_lea.vmem [#allocation4], %s314_s23  ;;  %s114_s30 = sshll.u32 %s112_s27, 4  ;;  %s115_s30 = int_to_ptr.hbm [resolvable:$true] %s114_s30 }
  0x14   : > { %s116_s29 = sshll.u32 %s105_s28, 4  ;;  %p333_p0 = pnand %p340_p13, %p555_p4  ;;  %s117_s29 = int_to_ptr.vmem [resolvable:$true] %s116_s29 }
  0x15   : > { %p317_p1 = scmp.ge.s32.totalorder %s502_s11, 1  ;;  %p121_p2 = scmp.lt.s32.totalorder %s502_s11, 3 }
  0x16   : > { %s102_s2 = scalar_lea.sflag [#allocation5], %s101_s22 }
  0x17   : > { %335 = dma.hbm_to_vmem [thread:$0]  (!%p333_p0), %s115_s30, 64, %s117_s29, %s102_s2  }
  0x18   : > { %p122_p3 = pnand %p317_p1, %p121_p2 }
  0x19   : > { %s588_s3 = sand.u32 (!%p122_p3), 1, %s486_s7  }
  0x1a   : > { %125 = sbr.rel (%p122_p3) target bundleno = 70 (0x46), region = 24  ;;  %s318_s4 = sshll.u32 (!%p122_p3), %s588_s3, 2 }
  0x1b   : > { %s128_s5 = scalar_lea.sflag (!%p122_p3), [#allocation5], %s588_s3  ;;  %s131_s12 = scalar_lea.vmem (!%p122_p3), [#allocation4], %s318_s4 }
  0x1f   : > { %473 = dma.done.wait (%p561_p8), %s128_s5, 64  }
  0x20   : > { %475 = vsyncadd (%p561_p8), %s128_s5, 4294967232  ;;  %v151_v0 = vld [vmem:[%s131_s12] sm:$0xf]  ;;  %vm160_vm0 = vcmask 1043456   ;;  %v183_v22 = vlaneseq  ;;  %s327_s13 = sshll.u32 %s494_s9, 2  ;;  %vm180_vm1 = vcmask 1040384  }
  0x21   : > { %v152_v1 = vunpack.c.l.bf16 %v151_v0  ;;  %s227_s17 = scalar_lea.hbm %s653_s1, %s327_s13  ;;  %s150_s9 = scalar_lea.vmem [#allocation7], %s318_s4 }
  0x22   : > { %vm603_vm2 = vcmp.lt.s32.totalorder %v183_v22, 256  ;;  %s229_s18 = sshll.u32 %s150_s9, 4  ;;  %s231_s22 = sshll.u32 %s227_s17, 4  ;;  %s230_s18 = int_to_ptr.vmem [resolvable:$true] %s229_s18  ;;  %s232_s22 = int_to_ptr.hbm [resolvable:$true] %s231_s22 }
  0x23   : > { %155 = vst [vmem:[#allocation1] ss:$2 sm:$0xff] %v152_v1  ;;  %s216_s23 = scalar_lea.sflag [#allocation6], %s588_s3  ;;  %s434_s24 = sshra.s32 %s232_s22, 4  ;;  %s435_s24 = int_to_ptr.hbm [resolvable:$true] %s434_s24 }
  0x24   : > { %s436_s25 = scalar_lea.hbm %s435_s24, 4  ;;  %s440_s28 = scalar_lea.hbm %s653_s1, 8 }
  0x25   : > { %p437_p4 = scmp.ne.s32.totalorder %s435_s24, %s436_s25  ;;  %p441_p7 = scmp.lt.s32.totalorder %s435_s24, %s653_s1 }
  0x26   : > { %p442_p8 = scmp.lt.s32.totalorder %s440_s28, %s436_s25 }
  0x27   : > { %p438_p5 = pnand %p437_p4, %p565_p9 }
  0x28   : > { %p443_p10 = por %p442_p8, %p441_p7 }
  0x29   : > { %p439_p6 = pneg %p438_p5 }
  0x2a   : > { %v156_v2 = vld.sshfl [vmem:[#allocation1] sm:$0xff pattern:$0x75316420]  ;;  %v157_v3 = vld.sshfl [vmem:[#allocation1 + $0x8] sm:$0xff pattern:$0x75316420] }
  0x2b   : > { %v161_v4 = vsel %vm160_vm0, %v156_v2, 0.0  ;;  %v168_v5 = vsel %vm160_vm0, %v157_v3, 0.0  ;;  %189 = vst [vmem:[#allocation1] ss:$2 sm:$0xff] %v152_v1  ;;  %p444_p13 = pnand %p443_p10, %p439_p6 }
  0x2c   : > { %v162_v6 = vrot.slane %v161_v4, 4  ;;  %v169_v7 = vrot.slane %v168_v5, 4 }
  0x2e   : > { %v163_v8 = vadd.f32 %v162_v6, %v161_v4  ;;  %v170_v9 = vadd.f32 %v169_v7, %v168_v5 }
  0x30   : > { %v164_v10 = vrot.slane %v163_v8, 2  ;;  %v171_v11 = vrot.slane %v170_v9, 2 }
  0x32   : > { %v165_v12 = vadd.f32 %v164_v10, %v163_v8  ;;  %v172_v13 = vadd.f32 %v171_v11, %v170_v9  ;;  %v190_v14 = vld.sshfl [vmem:[#allocation1] sm:$0xff pattern:$0x75316420]  ;;  %v191_v15 = vld.sshfl [vmem:[#allocation1 + $0x8] sm:$0xff pattern:$0x75316420] }
  0x33   : > { %v194_v16 = vsel %vm160_vm0, %v190_v14, -inf  ;;  %v201_v17 = vsel %vm160_vm0, %v191_v15, -inf }
  0x34   : > { %v166_v18 = vrot.slane %v165_v12, 1  ;;  %v173_v19 = vrot.slane %v172_v13, 1  ;;  %v195_v20 = vrot.slane %v194_v16, 4  ;;  %v202_v21 = vrot.slane %v201_v17, 4 }
  0x36   : > { %v167_v23 = vadd.f32 %v166_v18, %v165_v12  ;;  %v174_v24 = vadd.f32 %v173_v19, %v172_v13  ;;  %v196_v25 = vmax.f32 %v194_v16, %v195_v20  ;;  %v203_v26 = vmax.f32 %v201_v17, %v202_v21 }
  0x38   : > { %v176_v27 = vmul.f32 0.25, %v174_v24  ;;  %v197_v28 = vrot.slane %v196_v25, 2  ;;  %v204_v29 = vrot.slane %v203_v26, 2  ;;  %v175_v31 = vmul.f32 0.25, %v167_v23 }
  0x3a   : > { %v179_v32 = vrot.slane %v176_v27, 7  ;;  %v198_v33 = vmax.f32 %v196_v25, %v197_v28  ;;  %v205_v34 = vmax.f32 %v203_v26, %v204_v29 }
  0x3c   : > { %v181_v35 = vsel %vm180_vm1, %v175_v31, %v179_v32  ;;  %v199_v36 = vrot.slane %v198_v33, 1  ;;  %v206_v37 = vrot.slane %v205_v34, 1 }
  0x3d   : > { %187 = vst.msk [vmem:[%s150_s9] ss:$2 sm:$0x3] %vm603_vm2, %v181_v35 }
  0x3e   : > { %v207_v38 = vmax.f32 %v205_v34, %v206_v37  ;;  %v200_v39 = vmax.f32 %v198_v33, %v199_v36 }
  0x40   : > { %v210_v40 = vrot.slane %v207_v38, 7 }
  0x42   : > { %v211_v41 = vsel %vm180_vm1, %v200_v39, %v210_v40 }
  0x43   : > { %320 = vst.msk [vmem:[%s150_s9 + $0x1] ss:$2 sm:$0x3] %vm603_vm2, %v211_v41 }
  0x44   : > { %447 = shalt.err (!%p444_p13)
}
  0x45   : > { %330 = dma.vmem_to_hbm [thread:$0]  (%p565_p9), %s230_s18, 64, %s232_s22, %s216_s23  }
  0x46 PF: > { %s243_s2 = sand.u32 1, %s482_s6   ;;  %p337_p0 = pnand %p313_p12, %p572_p11 }
  0x47   : > { %s244_s3 = scalar_lea.sflag [#allocation6], %s243_s2 }
  0x48   : > { %p338_p1 = pneg %p337_p0 }
  0x4a   : > { %477 = dma.done.wait (%p338_p1), %s244_s3, 64  }
  0x4b   : > { %479 = vsyncadd (%p338_p1), %s244_s3, 4294967232  ;;  %s17_s11 = sadd.s32 1, %s502_s11   ;;  %s660_s6 = smov %s486_s7 }
  0x4c   : > { %p14_p2 = scmp.ge.s32.totalorder %s17_s11, 4   ;;  %s661_s7 = smov %s490_s8 }
  0x4d   : > { %s662_s8 = smov %s570_s20  ;;  %s663_s9 = smov %s498_s10 }
  0x4e   : > { %s664_s10 = smov %s666_s14  ;;  %16 = sbr.rel (!%p14_p2) target bundleno = 6 (0x6), region = 70 }
  0x53   :  { %250 = vsyncpa [#allocation5], 1 }
  0x54   :  { %252 = vsyncpa [#allocation5 + $0x1], 1 }
  0x55   :  { %253 = vsyncpa [#allocation6], 1 }
  0x56   :  { %255 = vsyncpa [#allocation6 + $0x1], 1 }

</bundles_post_ra>
